<compile_context>
chip_gen: v6e
topology: v6e:2x2x1
jax: 0.10.0
libtpu: 0.0.40
codegen_flags: <defaults>
</compile_context>

<pallas_src>
import math

import jax
import jax.numpy as jnp
from jax.experimental import pallas as pl
from jax.experimental.pallas import tpu as pltpu


def conv1x1_kernel(x_ref, w_ref, b_ref, o_ref):
    # x_ref: (Cin, T), w_ref: (Cout, Cin), b_ref: (Cout, 1), o_ref: (Cout, T)
    x = x_ref[...]
    w = w_ref[...]
    b = b_ref[...]
    # K = Cin = 3 contraction on the MXU (vector-extended slot has huge slack);
    # HIGHEST precision keeps f32 accuracy for f32 inputs (multi-pass matmul).
    acc = jnp.dot(w, x,
                  preferred_element_type=jnp.float32,
                  precision=jax.lax.Precision.HIGHEST)
    o_ref[...] = (acc + b).astype(o_ref.dtype)


def _vmem_budget_bytes():
    """Generation-aware budget for the double-buffered in+out working set."""
    try:
        cap = pltpu.get_tpu_info().vmem_capacity_bytes
    except Exception:  # not on TPU / info unavailable -> conservative default
        cap = 64 * 1024 * 1024
    # Leave ample headroom for Mosaic temporaries inside every scoped-VMEM
    # default (v5e 16 MiB, v6e 32 MiB, v7x 32 MiB per TensorCore).
    return max(2 * 1024 * 1024, min(6 * 1024 * 1024, cap // 10))


def _pick_spatial_tile(n, hw, cout, *, max_lanes=2048, min_grid_steps=8):
    """Lane-dense spatial tile: fits VMEM, but still gives a multi-step grid."""
    # Per lane column (f32, double-buffered): input padded to 8 sublanes plus
    # Cout output rows. Weight / bias are negligible.
    per_col = 2 * (8 + cout) * 4
    budget = _vmem_budget_bytes()
    t = max(128, min(max_lanes, ((budget // per_col) // 128) * 128))
    if hw <= t:
        t = hw  # single full-extent spatial block (always legal wrt (8,128))
    # Split further so the software pipeline has enough steps to overlap the
    # input DMA, MXU work, and the dominant output writeback, and so both v7x
    # TensorCores get grid steps. Never go below 128 lanes.
    while n * pl.cdiv(hw, t) < min_grid_steps:
        new_t = max(128, (((t // 2) + 127) // 128) * 128)
        if new_t >= t:
            break
        t = new_t
    return t


def no_backbone_forward(x_nchw, weight, bias):
    """1x1 conv forward, NCHW in / NCHW out.

    x_nchw : (N, Cin, H, W)              float32
    weight : (Cout, Cin) or (Cout, Cin, 1, 1)
    bias   : (Cout,)
    returns: (N, Cout, H, W)
    """
    N, Cin, H, W = x_nchw.shape
    weight = weight.reshape(weight.shape[0], -1)  # accept (Cout, Cin, 1, 1)
    Cout = weight.shape[0]
    HW = H * W

    # Contiguous reshape only -- no transpose passes through HBM.
    x3 = x_nchw.reshape(N, Cin, HW)
    b2 = bias.reshape(Cout, 1)

    T = _pick_spatial_tile(N, HW, Cout)
    grid = (N, pl.cdiv(HW, T))

    cost = pl.CostEstimate(
        flops=2 * Cin * Cout * N * HW,
        transcendentals=0,
        bytes_accessed=4 * (Cin + Cout) * N * HW + 4 * Cout * (Cin + 1),
    )

    out3 = pl.pallas_call(
        conv1x1_kernel,
        out_shape=jax.ShapeDtypeStruct((N, Cout, HW), x_nchw.dtype),
        grid_spec=pltpu.PrefetchScalarGridSpec(
            num_scalar_prefetch=0,
            grid=grid,
            in_specs=[
                pl.BlockSpec((None, Cin, T), lambda n, j: (n, 0, j)),
                pl.BlockSpec((Cout, Cin), lambda n, j: (0, 0)),
                pl.BlockSpec((Cout, 1), lambda n, j: (0, 0)),
            ],
            out_specs=pl.BlockSpec((None, Cout, T), lambda n, j: (n, 0, j)),
        ),
        compiler_params=pltpu.CompilerParams(
            # Both axes independent; runtime may shard them across v7x's 2 TCs.
            dimension_semantics=("parallel", "parallel"),
            vmem_limit_bytes=32 * 1024 * 1024,
        ),
        cost_estimate=cost,
    )(x3, weight, b2)

    return out3.reshape(N, Cout, H, W)


def init_params(key, hidden_dim=32, in_channels=3):
    """Deterministic init matching nn.Conv2d(3, hidden_dim, 1) param shapes."""
    kw, kb = jax.random.split(key)
    fan_in = in_channels * 1 * 1
    bound = 1.0 / math.sqrt(fan_in)
    # torch weight is (Cout, Cin, 1, 1); store squeezed as (Cout, Cin)
    weight = jax.random.uniform(kw, (hidden_dim, in_channels),
                                minval=-bound, maxval=bound,
                                dtype=jnp.float32)
    bias = jax.random.uniform(kb, (hidden_dim,),
                              minval=-bound, maxval=bound,
                              dtype=jnp.float32)
    return weight, bias


if __name__ == "__main__":
    key = jax.random.PRNGKey(0)
    k_x, k_p = jax.random.split(key)

    N, Cin, H, W = 2, 3, 16, 16
    hidden_dim = 32  # small test size; module default of 256 works identically

    x = jax.random.normal(k_x, (N, Cin, H, W), dtype=jnp.float32)
    weight, bias = init_params(k_p, hidden_dim=hidden_dim, in_channels=Cin)

    out = jax.block_until_ready(no_backbone_forward(x, weight, bias))

    # Exact f32 elementwise reference (no MXU involved).
    ref = (x[:, None, :, :, :] * weight[None, :, :, None, None]).sum(axis=2) \
          + bias[None, :, None, None]

    assert out.shape == (N, hidden_dim, H, W)
    assert jnp.allclose(out, ref, atol=1e-4, rtol=1e-4), \
        float(jnp.max(jnp.abs(out - ref)))

    print("KERNEL_OK")
</pallas_src>

<mosaic_0001>
module attributes {stable_mosaic.version = 11 : i64} {
  func.func @conv1x1_kernel(%arg0: i32, %arg1: i32, %arg2: memref<1x3x128xf32, #tpu.memory_space<vmem>>, %arg3: memref<32x3xf32, #tpu.memory_space<vmem>>, %arg4: memref<32x1xf32, #tpu.memory_space<vmem>>, %arg5: memref<1x32x128xf32, #tpu.memory_space<vmem>>) attributes {dimension_semantics = [#tpu.dimension_semantics<parallel>, #tpu.dimension_semantics<parallel>], iteration_bounds = array<i64: 2, 2>, scalar_prefetch = 0 : i64, scratch_operands = 0 : i64, tpu.core_type = #tpu.core_type<tc>, window_params = [{transform_indices = @transform_0, window_bounds = array<i64: 1, 3, 128>}, {pipeline_mode = #tpu.pipeline_mode<synchronous>, transform_indices = @transform_1, window_bounds = array<i64: 32, 3>}, {pipeline_mode = #tpu.pipeline_mode<synchronous>, transform_indices = @transform_2, window_bounds = array<i64: 32, 1>}, {transform_indices = @transform_3, window_bounds = array<i64: 1, 32, 128>}]} {
    %c0 = arith.constant 0 : index
    %c0_0 = arith.constant 0 : index
    %c0_1 = arith.constant 0 : index
    %0 = vector.load %arg2[%c0, %c0_0, %c0_1] : memref<1x3x128xf32, #tpu.memory_space<vmem>>, vector<1x3x128xf32>
    %1 = vector.shape_cast %0 : vector<1x3x128xf32> to vector<3x128xf32>
    %c0_2 = arith.constant 0 : index
    %c0_3 = arith.constant 0 : index
    %2 = vector.load %arg3[%c0_2, %c0_3] : memref<32x3xf32, #tpu.memory_space<vmem>>, vector<32x3xf32>
    %c0_4 = arith.constant 0 : index
    %c0_5 = arith.constant 0 : index
    %3 = vector.load %arg4[%c0_4, %c0_5] : memref<32x1xf32, #tpu.memory_space<vmem>>, vector<32x1xf32>
    %cst = arith.constant dense<0.000000e+00> : vector<32x128xf32>
    %4 = tpu.matmul %2, %1, %cst {dimension_numbers = #tpu.dot_dimension_numbers<[1], [0], [0], [1], [0, 0, 1, 1], [], []>, precision = #tpu.contract_precision<fp32>} : vector<32x3xf32>, vector<3x128xf32>, vector<32x128xf32> -> vector<32x128xf32>
    %5 = vector.broadcast %3 : vector<32x1xf32> to vector<32x128xf32>
    %6 = arith.addf %4, %5 : vector<32x128xf32>
    %c0_6 = arith.constant 0 : index
    %c0_7 = arith.constant 0 : index
    %c0_8 = arith.constant 0 : index
    %7 = vector.load %arg5[%c0_6, %c0_7, %c0_8] : memref<1x32x128xf32, #tpu.memory_space<vmem>>, vector<1x32x128xf32>
    %8 = vector.shape_cast %7 : vector<1x32x128xf32> to vector<32x128xf32>
    %9 = vector.shape_cast %6 : vector<32x128xf32> to vector<1x32x128xf32>
    tpu.vector_store %arg5[%c0_6, %c0_7, %c0_8], %9 {strides = array<i32>} : memref<1x32x128xf32, #tpu.memory_space<vmem>>, vector<1x32x128xf32>,
    return
  }
  func.func @transform_0(%arg0: i32, %arg1: i32) -> (i32, i32, i32) {
    %c0_i32 = arith.constant 0 : i32
    %c0_i32_0 = arith.constant 0 : i32
    return %arg0, %c0_i32, %arg1 : i32, i32, i32
  }
  func.func @transform_1(%arg0: i32, %arg1: i32) -> (i32, i32) {
    %c0_i32 = arith.constant 0 : i32
    %c0_i32_0 = arith.constant 0 : i32
    %c0_i32_1 = arith.constant 0 : i32
    return %c0_i32, %c0_i32_0 : i32, i32
  }
  func.func @transform_2(%arg0: i32, %arg1: i32) -> (i32, i32) {
    %c0_i32 = arith.constant 0 : i32
    %c0_i32_0 = arith.constant 0 : i32
    %c0_i32_1 = arith.constant 0 : i32
    return %c0_i32, %c0_i32_0 : i32, i32
  }
  func.func @transform_3(%arg0: i32, %arg1: i32) -> (i32, i32, i32) {
    %c0_i32 = arith.constant 0 : i32
    %c0_i32_0 = arith.constant 0 : i32
    return %arg0, %c0_i32, %arg1 : i32, i32, i32
  }
}

</mosaic_0001>

<bundles_post_ra>
// kernel: tpu_custom_call.1
= control target key start
LH: loop header
LB: loop body
LE: loop exit
PB: predicated region body
PF: predicated region fallthrough
CT: control target
= control target key end

     0   :  { %8 = vsyncpa [#allocation3], 0  ;;  %s1395_s0 = inlined_call_operand.vmem [shape: f32[2,3,256], index: 0, kind: input, shape index: {}]   ;;  %s1396_s1 = inlined_call_operand.vmem [shape: f32[32,3], index: 1, kind: input, shape index: {}]   ;;  %s1397_s2 = inlined_call_operand.vmem [shape: f32[32,1], index: 2, kind: input, shape index: {}]   ;;  %s1398_s3 = inlined_call_operand.hbm [shape: f32[2,32,256], index: 3, kind: output, shape index: {}]  }
   0x1   :  { %10 = vsyncpa [#allocation3 + $0x1], 0  ;;  %s1202_s12 = smov 0   ;;  %s1204_s13 = smov 0  }
   0x2   :  { %s1206_s14 = smov 0   ;;  %s1208_s15 = smov 0  }
   0x3   :  { %s1210_s16 = smov 0   ;;  %s1212_s17 = smov 0  }
   0x4   :  { %s1214_s18 = smov 0   ;;  %s1216_s19 = smov 0  }
   0x5 LB: > { %s915_s20 = sadd.s32 4294967295, %s1175_s19   ;;  %s916_s21 = sadd.s32 4294967294, %s1175_s19   ;;  %s1175_s19 = sphi %s1216_s19, %s16_s19   ;;  %s1171_s18 = sphi %s1214_s18, %s1407_s18   ;;  %s1167_s17 = sphi %s1212_s17, %s1406_s17   ;;  %s1163_s16 = sphi %s1210_s16, %s1405_s16   ;;  %s1159_s15 = sphi %s1208_s15, %s1404_s15   ;;  %s1155_s14 = sphi %s1206_s14, %s1403_s14   ;;  %s1151_s13 = sphi %s1204_s13, %s1402_s13   ;;  %s1147_s12 = sphi %s1202_s12, %s1401_s12  }
   0x6   : > { %s25_s22 = sadd.s32 1, %s1167_s17  ;;  %s28_s23 = sadd.s32 1, %s1171_s18 }
   0x7   : > { %p26_p0 = scmp.ge.s32.totalorder %s25_s22, 2  ;;  %p117_p1 = scmp.ne.s32.totalorder %s1155_s14, %s1151_s13 }
   0x8   : > { %p118_p2 = scmp.eq.s32.totalorder %s915_s20, 3  ;;  %p123_p5 = scmp.ne.s32.totalorder %s1151_s13, %s1147_s12 }
   0x9   : > { %s1409_s22 = smov (%p26_p0, %s25_s22), 0  ;;  %s1411_s23 = smov (!%p26_p0, %s28_s23), %s1171_s18 }
   0xa   : > { %s103_s24 = ssub.s32 %s1167_s17, %s1409_s22  ;;  %p1253_p3 = por %p118_p2, %p117_p1 }
   0xb   : > { %p30_p4 = scmp.ge.s32.totalorder %s1411_s23, 2  ;;  %p124_p6 = scmp.eq.s32.totalorder %s916_s21, 3 }
   0xc   : > { %p919_p7 = scmp.ge.s32.totalorder %s1175_s19, 1  ;;  %p159_p9 = scmp.lt.s32.totalorder %s1175_s19, 5 }
   0xd   : > { %s1413_s23 = smov (%p30_p4, %s1411_s23), 0  ;;  %p1262_p8 = por %p124_p6, %p123_p5 }
   0xe   : > { %s102_s27 = ssub.s32 %s1171_s18, %s1413_s23  ;;  %s107_s28 = sadd.s32 1, %s1155_s14 }
   0xf   : > { %s104_s29 = sor.u32 %s103_s24, %s102_s27  ;;  %p160_p10 = pnand %p919_p7, %p159_p9 }
  0x10   : > { %p105_p11 = scmp.eq.s32.totalorder %s104_s29, 0  ;;  %p186_p12 = scmp.lt.s32.totalorder (!%p160_p10), %s1163_s16, 1 }
  0x11   : > { %163 = sbr.rel (%p160_p10) target bundleno = 275 (0x113), region = 32  ;;  %p188_p13 = scmp.lt.s32.totalorder (!%p160_p10), %s1159_s15, 1 }
  0x12   : > { %s1271_s30 = scalar_select %p105_p11, %s1155_s14, %s107_s28  }
  0x13   : > { %s924_s28 = sshll.u32 (!%p160_p10), %s1163_s16, 3 }
  0x16   : > { %v195_v0 = vld [vmem:[%s1396_s1] sm:$0xff]  ;;  %vm223_vm0 = vcmask 23552   ;;  %v196_v1 = vld [vmem:[%s1396_s1 + $0x8] sm:$0xff]  ;;  %v197_v4 = vld [vmem:[%s1396_s1 + $0x10] sm:$0xff]  ;;  %s187_s24 = scalar_select %p186_p12, %s1163_s16, 1  ;;  %v1177_v11 = vmov 0  }
  0x17   : > { %v225_v2 = vsel %vm223_vm0, %v195_v0, 0  ;;  %v228_v3 = vsel %vm223_vm0, %v196_v1, 0  ;;  %v198_v5 = vld [vmem:[%s1396_s1 + $0x18] sm:$0xff]  ;;  %v199_v6 = vld [vmem:[%s1397_s2] sm:$0xff]  ;;  %v231_v9 = vsel %vm223_vm0, %v197_v4, 0  ;;  %1081 = vset.pattern.permute.xlu0 %v1177_v11  ;;  %1082 = vset.pattern.permute.xlu1 %v1177_v11  ;;  %v201_v12 = vld [vmem:[%s1397_s2 + $0x10] sm:$0xff] }
  0x18   : > { %v1291_v7 = vand.u32 4294901760, %v225_v2  ;;  %v1293_v8 = vand.u32 4294901760, %v228_v3  ;;  %v234_v10 = vsel %vm223_vm0, %v198_v5, 0  ;;  %s189_s29 = scalar_select %p188_p13, %s1159_s15, 1  ;;  %v1301_v13 = vand.u32 4294901760, %v231_v9  ;;  %205 = vperm.xlu0 %1081, %v199_v6   ;;  %215 = vperm.xlu1 %1082, %v201_v12   ;;  %v200_v17 = vld [vmem:[%s1397_s2 + $0x8] sm:$0xff] }
  0x19   : > { %v1303_v14 = vand.u32 4294901760, %v234_v10  ;;  %s921_s4 = sshll.u32 %s187_s24, 1  ;;  %v202_v18 = vld [vmem:[%s1397_s2 + $0x18] sm:$0xff]  ;;  %vm236_vm1 = vcmask 1042432   ;;  %s183_s24 = sand.u32 1, %s1151_s13  }
  0x1a   : > { %v307_v15 = vsub.f32 %v225_v2, %v1291_v7  ;;  %v317_v16 = vsub.f32 %v228_v3, %v1293_v8  ;;  %968 = vmatprep.mubr.f32.mxu1 %v1291_v7  ;;  %s191_s9 = sadd.s32 %s921_s4, %s189_s29  ;;  %v327_v19 = vsub.f32 %v231_v9, %v1301_v13  ;;  %s920_s27 = sshll.u32 %s183_s24, 5 }
  0x1b   : > { %v337_v20 = vsub.f32 %v234_v10, %v1303_v14  ;;  %s922_s10 = sshll.u32 %s191_s9, 2  ;;  %s831_s29 = sadd.s32 %s1159_s15, %s924_s28 }
  0x1c   : > { %v308_v21 = vand.u32 4294901760, %v307_v15  ;;  %v318_v22 = vand.u32 4294901760, %v317_v16  ;;  %s193_s21 = scalar_lea.vmem %s1395_s0, %s922_s10  ;;  %v328_v23 = vand.u32 4294901760, %v327_v19  ;;  %210 = vperm.xlu0 %1081, %v200_v17   ;;  %220 = vperm.xlu1 %1082, %v202_v18   ;;  %s185_s4 = scalar_lea.vmem [#allocation2], %s920_s27 }
  0x1d   : > { %v338_v24 = vand.u32 4294901760, %v337_v20  ;;  %v194_v25 = vld [vmem:[%s193_s21] sm:$0x7]  ;;  %s834_s5 = sshll.u32 %s185_s4, 4  ;;  %s925_s16 = sshll.u32 %s831_s29, 7  ;;  %s1335_s5 = int_to_ptr.vmem [resolvable:$true] %s834_s5 }
  0x1e   : > { %v309_v26 = vsub.f32 %v307_v15, %v308_v21  ;;  %v319_v27 = vsub.f32 %v317_v16, %v318_v22  ;;  %v238_v28 = vsel %vm236_vm1, %v194_v25, 0  ;;  %v329_v29 = vsub.f32 %v327_v19, %v328_v23  ;;  %s1340_s7 = scalar_lea.hbm %s1398_s3, %s925_s16  ;;  %s1344_s8 = scalar_lea.sflag [#allocation3], %s183_s24 }
  0x1f   : > { %v271_v30 = vand.u32 4294901760, %v238_v28  ;;  %v339_v33 = vsub.f32 %v337_v20, %v338_v24  ;;  %s1083_s9 = scalar_lea.vmem %s1335_s5, 512  ;;  %s1178_s10 = smov [#allocation2]  }
  0x20   : > { %v310_v31 = vand.u32 4294901760, %v309_v26  ;;  %v320_v32 = vand.u32 4294901760, %v319_v27  ;;  %v330_v34 = vand.u32 4294901760, %v329_v29  ;;  %p1084_p0 = scmp.ne.s32.totalorder %s1335_s5, %s1083_s9  ;;  %s1087_s11 = sshll.u32 %s1178_s10, 4  ;;  %s1088_s11 = int_to_ptr.vmem [resolvable:$false] %s1087_s11 }
  0x21   : > { %958 = vmatprep.subr.mxu0 %v271_v30  ;;  %v378_v35 = vsub.f32 %v238_v28, %v271_v30  ;;  %v340_v36 = vand.u32 4294901760, %v339_v33  ;;  %s1089_s20 = scalar_lea.vmem %s1088_s11, 1024  ;;  %p1090_p4 = scmp.lt.s32.totalorder %s1335_s5, %s1088_s11 }
  0x22   : > { %960 = vmatprep.mubr.f32.mxu0 %v310_v31  ;;  %959 = vmatpush3.msra.mxu0 %v271_v30  ;;  %p1085_p1 = pnand %p1084_p0, %p1253_p3  ;;  %p1091_p5 = scmp.lt.s32.totalorder %s1089_s20, %s1083_s9 }
  0x23   : > { %961 = vmatmul.mubr.f32.vlgmr.msra.gmra.mxu0 %v320_v32  ;;  %v379_v37 = vand.u32 4294901760, %v378_v35  ;;  %974 = vmatprep.subr.mxu0 %v378_v35 }
  0x24   : > { %963 = vmatprep.mubr.f32.mxu0 %v330_v34  ;;  %975 = vmatpush3.msra.mxu0 %v378_v35  ;;  %p1086_p2 = pneg %p1085_p1  ;;  %p1092_p6 = por %p1091_p5, %p1090_p4 }
  0x25   : > { %v380_v38 = vsub.f32 %v378_v35, %v379_v37  ;;  %990 = vmatprep.subr.mxu0 %v379_v37 }
  0x26   : > { %p1093_p7 = pnand %p1092_p6, %p1086_p2 }
  0x27   : > { %964 = vmatmul.mubr.f32.gmra.mxu0 %v340_v36  ;;  %v381_v39 = vand.u32 4294901760, %v380_v38 }
  0x28   : > { %976 = vmatprep.mubr.f32.mxu0 %v307_v15 }
  0x29   : > { %966 = vmatprep.subr.mxu1 %v381_v39 }
  0x2a   : > { %967 = vmatpush3.msra.mxu1 %v381_v39 }
  0x2b   : > { %969 = vmatmul.mubr.f32.vlgmr.msra.gmra.mxu1 %v1293_v8  ;;  %982 = vmatprep.subr.mxu1 %v271_v30 }
  0x2c   : > { %983 = vmatpush3.msra.mxu1 %v271_v30  ;;  %977 = vmatmul.mubr.f32.vlgmr.msra.gmra.mxu0 %v317_v16 }
  0x2d   : > { %971 = vmatprep.mubr.f32.mxu1 %v1301_v13  ;;  %979 = vmatprep.mubr.f32.mxu0 %v327_v19 }
  0x2e   : > { %991 = vmatpush3.msra.mxu0 %v379_v37  ;;  %998 = vmatprep.subr.mxu1 %v271_v30 }
  0x2f   : > { %972 = vmatmul.mubr.f32.gmra.mxu1 %v1303_v14 }
  0x30   : > { %980 = vmatmul.mubr.f32.gmra.mxu0 %v337_v20  ;;  %984 = vmatprep.mubr.f32.mxu1 %v308_v21 }
  0x31   : > { %992 = vmatprep.mubr.f32.mxu0 %v1291_v7 }
  0x33   : > { %985 = vmatmul.mubr.f32.vlgmr.msra.gmra.mxu1 %v318_v22 }
  0x34   : > { %999 = vmatpush3.msra.mxu1 %v271_v30  ;;  %993 = vmatmul.mubr.f32.vlgmr.msra.gmra.mxu0 %v1293_v8 }
  0x35   : > { %987 = vmatprep.mubr.f32.mxu1 %v328_v23  ;;  %995 = vmatprep.mubr.f32.mxu0 %v1301_v13 }
  0x37   : > { %988 = vmatmul.mubr.f32.gmra.mxu1 %v338_v24 }
  0x38   : > { %996 = vmatmul.mubr.f32.gmra.mxu0 %v1303_v14  ;;  %1000 = vmatprep.mubr.f32.mxu1 %v1291_v7 }
  0x3b   : > { %1001 = vmatmul.mubr.f32.vlgmr.msra.gmra.mxu1 %v1293_v8 }
  0x3c   : > { %1003 = vmatprep.mubr.f32.mxu1 %v1301_v13 }
  0x3f   : > { %1004 = vmatmul.mubr.f32.gmra.mxu1 %v1303_v14 }
  0x93   : > { %v206_v41 = vpop.permute.xlu0 %205  ;;  %v216_v44 = vpop.permute.xlu1 %215 }
  0x97   : > { %v211_v45 = vpop.permute.xlu0 %210  ;;  %v221_v51 = vpop.permute.xlu1 %220 }
  0xe3   : > { %v962_v40 = vpop.f32.mrf.mxu0 }
  0xe4   : > { %v323_v48 = vadd.f32 %v962_v40, %v211_v45 }
  0xe5   : > { %v312_v42 = vpop.f32.mrf.mxu0 }
  0xe6   : > { %v313_v54 = vadd.f32 %v312_v42, %v206_v41 }
  0xe7   : > { %v965_v43 = vpop.f32.mrf.mxu0 }
  0xe8   : > { %v343_v56 = vadd.f32 %v965_v43, %v221_v51 }
  0xe9   : > { %v332_v46 = vpop.f32.mrf.mxu0 }
  0xea   : > { %v333_v62 = vadd.f32 %v332_v46, %v216_v44 }
  0xeb   : > { %v970_v47 = vpop.f32.mrf.mxu1 }
  0xec   : > { %v978_v49 = vpop.f32.mrf.mxu0  ;;  %v425_v55 = vadd.f32 %v970_v47, %v323_v48 }
  0xed   : > { %v418_v50 = vpop.f32.mrf.mxu1 }
  0xee   : > { %v510_v52 = vpop.f32.mrf.mxu0  ;;  %v419_v59 = vadd.f32 %v418_v50, %v313_v54  ;;  %v518_v63 = vadd.f32 %v978_v49, %v425_v55 }
  0xef   : > { %v973_v53 = vpop.f32.mrf.mxu1 }
  0xf0   : > { %v981_v57 = vpop.f32.mrf.mxu0  ;;  %v437_v0 = vadd.f32 %v973_v53, %v343_v56  ;;  %v511_v3 = vadd.f32 %v510_v52, %v419_v59 }
  0xf1   : > { %v430_v58 = vpop.f32.mrf.mxu1 }
  0xf2   : > { %v524_v60 = vpop.f32.mrf.mxu0  ;;  %v431_v4 = vadd.f32 %v430_v58, %v333_v62  ;;  %v532_v8 = vadd.f32 %v981_v57, %v437_v0 }
  0xf3   : > { %v986_v61 = vpop.f32.mrf.mxu1 }
  0xf4   : > { %v994_v1 = vpop.f32.mrf.mxu0  ;;  %v614_v5 = vadd.f32 %v986_v61, %v518_v63  ;;  %v525_v12 = vadd.f32 %v524_v60, %v431_v4 }
  0xf5   : > { %v605_v2 = vpop.f32.mrf.mxu1 }
  0xf6   : > { %v703_v6 = vpop.f32.mrf.mxu0  ;;  %v606_v9 = vadd.f32 %v605_v2, %v511_v3  ;;  %v710_v13 = vadd.f32 %v994_v1, %v614_v5 }
  0xf7   : > { %v989_v7 = vpop.f32.mrf.mxu1 }
  0xf8   : > { %v997_v11 = vpop.f32.mrf.mxu0  ;;  %v630_v14 = vadd.f32 %v989_v7, %v532_v8  ;;  %v704_v16 = vadd.f32 %v703_v6, %v606_v9 }
  0xf9   : > { %v621_v10 = vpop.f32.mrf.mxu1 }
  0xfa   : > { %v622_v17 = vadd.f32 %v621_v10, %v525_v12  ;;  %v715_v19 = vpop.f32.mrf.mxu0  ;;  %v722_v21 = vadd.f32 %v997_v11, %v630_v14 }
  0xfb   : > { %v1002_v15 = vpop.f32.mrf.mxu1 }
  0xfc   : > { %v800_v18 = vadd.f32 %v1002_v15, %v710_v13  ;;  %v716_v24 = vadd.f32 %v715_v19, %v622_v17 }
  0xfd   : > { %v793_v20 = vpop.f32.mrf.mxu1 }
  0xfe   : > { %816 = vst [vmem:[%s185_s4 + $0x8] sm:$0xff] %v800_v18  ;;  %v794_v22 = vadd.f32 %v793_v20, %v704_v16 }
  0xff   : > { %v1005_v23 = vpop.f32.mrf.mxu1 }
 0x100   : > { %815 = vst [vmem:[%s185_s4] sm:$0xff] %v794_v22  ;;  %v812_v25 = vadd.f32 %v1005_v23, %v722_v21 }
 0x101   : > { %v805_v26 = vpop.f32.mrf.mxu1 }
 0x102   : > { %818 = vst [vmem:[%s185_s4 + $0x18] sm:$0xff] %v812_v25  ;;  %v806_v27 = vadd.f32 %v805_v26, %v716_v24 }
 0x104   : > { %817 = vst [vmem:[%s185_s4 + $0x10] sm:$0xff] %v806_v27 }
 0x105   : > { %1096 = shalt.err (!%p1093_p7)
}
 0x106   : > { %s1097_s21 = scalar_lea.hbm %s1340_s7, 512  ;;  %s1101_s28 = scalar_lea.hbm %s1398_s3, 2048 }
 0x107   : > { %p1098_p9 = scmp.ne.s32.totalorder %s1340_s7, %s1097_s21  ;;  %p1102_p12 = scmp.lt.s32.totalorder %s1340_s7, %s1398_s3 }
 0x108   : > { %p1103_p13 = scmp.lt.s32.totalorder %s1101_s28, %s1097_s21 }
 0x109   : > { %p1099_p10 = pnand %p1098_p9, %p1253_p3 }
 0x10a   : > { %p1104_p0 = por %p1103_p13, %p1102_p12 }
 0x10b   : > { %p1100_p11 = pneg %p1099_p10 }
 0x10d   : > { %p1105_p1 = pnand %p1104_p0, %p1100_p11 }
 0x10f   : > { %1108 = shalt.err (!%p1105_p1)
}
 0x110   : > { %s1179_s16 = smov 128   ;;  %s1180_s15 = smov 256  }
 0x111   : > { %s1181_s6 = smov 8  }
 0x112   : > { %1006 = dma.vmem_to_hbm [thread:$0]  (%p1253_p3), %s1335_s5, 512, %s1340_s7, %s1344_s8, %s1179_s16, %s1180_s15, %s1181_s6  }
 0x113 PF: > { %p1012_p2 = scmp.ge.s32.totalorder %s1175_s19, 2  ;;  %s849_s9 = sand.u32 1, %s1147_s12  }
 0x114   : > { %s850_s10 = scalar_lea.sflag [#allocation3], %s849_s9 }
 0x115   : > { %p1009_p4 = pnand %p1012_p2, %p1262_p8 }
 0x117   : > { %p1010_p5 = pneg %p1009_p4 }
 0x119   : > { %1142 = dma.done.wait (%p1010_p5), %s850_s10, 512  }
 0x11a   : > { %1144 = vsyncadd (%p1010_p5), %s850_s10, 4294966784  ;;  %s16_s19 = sadd.s32 1, %s1175_s19   ;;  %s1401_s12 = smov %s1151_s13 }
 0x11b   : > { %p13_p6 = scmp.ge.s32.totalorder %s16_s19, 6   ;;  %s1402_s13 = smov %s1155_s14 }
 0x11c   : > { %s1403_s14 = smov %s1271_s30  ;;  %s1404_s15 = smov %s1167_s17 }
 0x11d   : > { %s1405_s16 = smov %s1171_s18  ;;  %s1406_s17 = smov %s1409_s22 }
 0x11e   : > { %s1407_s18 = smov %s1413_s23  ;;  %15 = sbr.rel (!%p13_p6) target bundleno = 5 (0x5), region = 67 }
 0x123   :  { %855 = vsyncpa [#allocation3], 1 }
 0x124   :  { %857 = vsyncpa [#allocation3 + $0x1], 1 }

</bundles_post_ra>
